<compile_context>
chip_gen: v7x
topology: tpu7x:2x2x1
jax: 0.10.0
libtpu: 0.0.40
codegen_flags: <defaults>
</compile_context>

<pallas_src>
import jax
import jax.numpy as jnp
from jax.experimental import pallas as pl
from jax.experimental.pallas import tpu as pltpu


def biaffine_kernel(s_in_ref, t_in_ref, w_enc_ref, b_enc_ref, w_dec_ref,
                    b_dec_ref, w_d_tiled_ref, w_e_t_ref, bias_ref,
                    u_cat_ref, seg_ref, out_ref, t_lane_ref):
    """One batch-block of the biaffine forward.

    s_in_ref:   [Bb, De]      (mxu dtype, streamed)
    t_in_ref:   [Bb, N*Dd]    (mxu dtype, streamed; row-major [b, n*Dd+d])
    w_enc_ref:  [De, H]       (mxu dtype, resident)
    b_enc_ref:  [1, H]        f32
    w_dec_ref:  [Dd, H]       (mxu dtype)   <-- plain decoder weight, NOT block-diagonal
    b_dec_ref:  [1, H]        f32
    w_d_tiled_ref: [1, N*H]   f32   (W_d flattened, lane-aligned with t_lane)
    w_e_t_ref:  [H, N]        (mxu dtype)
    bias_ref:   [1, N]        f32
    u_cat_ref:  [H, N*H]      U_cat[d, n*H+e] = U[n, d, e] (mxu dtype)
    seg_ref:    [N*H, N]      segment-sum selector (block-diag ones), f32
    out_ref:    [Bb, N]       f32
    t_lane_ref: [Bb, N*H]     f32 VMEM scratch (decoder activations, lane-dense)
    """
    n_labels = seg_ref.shape[1]
    hidden = w_enc_ref.shape[1]
    dec_dim = w_dec_ref.shape[0]

    # Encoder linear: [Bb, H] (f32 accumulate on MXU).
    s = jnp.dot(s_in_ref[...], w_enc_ref[...],
                preferred_element_type=jnp.float32) + b_enc_ref[...]

    # Decoder linear for all N teachers: short static-unrolled loop of small dots that
    # fill a lane-dense [Bb, N*H] scratch. No kron'd weight, no N x zero FLOPs.
    for n in range(n_labels):                      # N is small; unrolled at trace time
        t_n = jnp.dot(t_in_ref[:, n * dec_dim:(n + 1) * dec_dim], w_dec_ref[...],
                      preferred_element_type=jnp.float32) + b_dec_ref[...]
        t_lane_ref[:, n * hidden:(n + 1) * hidden] = t_n
    t_lane = t_lane_ref[...]

    # Bilinear selector: su[b, n*H+e] = sum_d s[b,d] * U[n,d,e]  -> [Bb, N*H].
    su = jnp.dot(s.astype(u_cat_ref.dtype), u_cat_ref[...],
                 preferred_element_type=jnp.float32)

    # Fused bilinear + out_d:  ((su + W_d_tiled) * t_lane) @ seg_ones -> [Bb, N].
    prod = (su + w_d_tiled_ref[...]) * t_lane
    bil_plus_d = jnp.dot(prod, seg_ref[...], preferred_element_type=jnp.float32)

    # out_e = s @ W_e^T -> [Bb, N];   energy = bil + out_d + out_e + b.
    out_e = jnp.dot(s.astype(w_e_t_ref.dtype), w_e_t_ref[...],
                    preferred_element_type=jnp.float32)
    energy = bil_plus_d + out_e + bias_ref[...]

    # Softmax over the teacher/label axis (dim 1).
    m = jnp.max(energy, axis=1, keepdims=True)
    e = jnp.exp(energy - m)
    denom = jnp.sum(e, axis=1, keepdims=True)
    inv = pl.reciprocal(denom, approx=True)        # EUP slot (otherwise idle)
    inv = inv * (2.0 - denom * inv)                # one Newton step -> ~f32-accurate
    out_ref[...] = e * inv


def prepare_params(params, *, mxu_dtype=jnp.float32):
    """One-time weight re-layout (hoisted off the per-call path).

    Use mxu_dtype=jnp.bfloat16 on v6e/v7x: the MXUs are bf16-native and it halves the
    HBM/VMEM footprint of U and the streamed batch tiles. f32 accumulation and the
    VPU/softmax math stay f32 regardless.
    """
    n_labels, hidden = params["w_d"].shape
    # U_cat[d, n*H + e] = U[n, d, e]
    u_cat = jnp.transpose(params["u"], (1, 0, 2)).reshape(hidden, n_labels * hidden)
    return {
        "num_labels": n_labels,
        "hidden": hidden,
        "enc_dim": params["w_enc"].shape[0],
        "dec_dim": params["w_dec"].shape[0],
        "mxu_dtype": mxu_dtype,
        "w_enc": params["w_enc"].astype(mxu_dtype),                        # [De, H]
        "b_enc": params["b_enc"].astype(jnp.float32),                      # [1, H]
        "w_dec": params["w_dec"].astype(mxu_dtype),                        # [Dd, H] (no kron)
        "b_dec": params["b_dec"].astype(jnp.float32),                      # [1, H]
        "w_d_tiled": params["w_d"].reshape(1, n_labels * hidden).astype(jnp.float32),
        "w_e_t": params["w_e"].T.astype(mxu_dtype),                        # [H, N]
        "bias": params["bias"].astype(jnp.float32),                        # [1, N]
        "u_cat": u_cat.astype(mxu_dtype),                                  # [H, N*H]
        "seg": jnp.kron(jnp.eye(n_labels, dtype=jnp.float32),
                        jnp.ones((hidden, 1), jnp.float32)),               # [N*H, N]
    }


def _round_up(x, m):
    return ((x + m - 1) // m) * m


def _choose_block_b(batch, cap):
    """Largest divisor of `batch` that is <= cap and either a multiple of 8 or == batch."""
    cap = int(max(1, min(cap, batch)))
    for cand in range(cap, 0, -1):
        if batch % cand == 0 and (cand % 8 == 0 or cand == batch):
            return cand
    return batch


def biaffine_attention(input_s, input_t, prepped, *, block_b=None,
                       vmem_budget_bytes=48 * 1024 * 1024):
    B, enc_dim = input_s.shape
    Bt, num_teachers, dec_dim = input_t.shape
    assert B == Bt, "batch sizes of encoder and decoder are required to be equal"
    N = prepped["num_labels"]
    assert num_teachers == N, "num_teachers must equal num_labels for this module"
    assert enc_dim == prepped["enc_dim"] and dec_dim == prepped["dec_dim"]
    H = prepped["hidden"]
    mxu_dtype = prepped["mxu_dtype"]
    itemsize = jnp.dtype(mxu_dtype).itemsize

    weights = (prepped["w_enc"], prepped["b_enc"], prepped["w_dec"], prepped["b_dec"],
               prepped["w_d_tiled"], prepped["w_e_t"], prepped["bias"],
               prepped["u_cat"], prepped["seg"])
    weight_bytes = sum(int(w.nbytes) for w in weights)   # single-buffered (Buffered(1))

    # Per-row VMEM: double-buffered streamed inputs + double-buffered output + t_lane scratch.
    per_row_bytes = 2 * (enc_dim + N * dec_dim) * itemsize + 2 * N * 4 + N * H * 4

    if block_b is None:
        cap_rows = (vmem_budget_bytes - weight_bytes - (4 << 20)) // max(per_row_bytes, 1)
        cap_rows = max(8, min(512, (int(cap_rows) // 8) * 8))
        if B >= 16:
            # Guarantee >= 2 grid steps so the "parallel" batch axis can shard across
            # v7x's two TensorCores.
            cap_rows = min(cap_rows, _round_up((B + 1) // 2, 8))
        block_b = _choose_block_b(B, cap_rows)
    assert B % block_b == 0, "batch must be divisible by the batch block"
    grid = (B // block_b,)

    needed_bytes = weight_bytes + block_b * per_row_bytes + (8 << 20)   # + compiler scratch slack
    vmem_limit_bytes = int(min(60 << 20, max(needed_bytes, 20 << 20)))

    s = input_s.astype(mxu_dtype)
    t_flat = input_t.reshape(B, N * dec_dim).astype(mxu_dtype)   # row-major: [b, n*Dd+d]

    def const_spec(a):
        # Full-extent block, constant index map, single pipeline buffer:
        # weight stays VMEM-resident across all grid steps with no second copy.
        return pl.BlockSpec(a.shape, lambda i, nd=a.ndim: (0,) * nd,
                            pipeline_mode=pl.Buffered(1))

    in_specs = [
        pl.BlockSpec((block_b, enc_dim), lambda i: (i, 0)),
        pl.BlockSpec((block_b, N * dec_dim), lambda i: (i, 0)),
    ] + [const_spec(w) for w in weights]
    out_specs = pl.BlockSpec((block_b, N), lambda i: (i, 0))

    flops = 2 * B * (enc_dim * H                    # encoder linear
                     + N * dec_dim * H              # decoder linear (no block-diag waste)
                     + H * (N * H)                  # bilinear selector
                     + (N * H) * N                  # segmented reduce
                     + H * N)                       # out_e
    bytes_accessed = int(s.nbytes + t_flat.nbytes + weight_bytes + B * N * 4)
    cost = pl.CostEstimate(flops=flops, transcendentals=B * (N + 1),
                           bytes_accessed=bytes_accessed)

    return pl.pallas_call(
        biaffine_kernel,
        out_shape=jax.ShapeDtypeStruct((B, N), jnp.float32),
        grid_spec=pltpu.PrefetchScalarGridSpec(
            num_scalar_prefetch=0,
            grid=grid,
            in_specs=in_specs,
            out_specs=out_specs,
            scratch_shapes=[pltpu.VMEM((block_b, N * H), jnp.float32)],
        ),
        compiler_params=pltpu.CompilerParams(
            dimension_semantics=("parallel",),
            vmem_limit_bytes=vmem_limit_bytes,
        ),
        cost_estimate=cost,
    )(s, t_flat, *weights)


def reference(input_s, input_t, params):
    """Pure-JAX mirror of the PyTorch forward (masks=None)."""
    s = input_s @ params["w_enc"] + params["b_enc"][0]
    t = jnp.einsum("bnd,dh->bnh", input_t, params["w_dec"]) + params["b_dec"][0]
    out_e = (params["w_e"] @ s.T).T                        # [B, N]
    out_d = jnp.einsum("nd,bnd->bn", params["w_d"], t)     # [B, N]
    tmp = jnp.einsum("bd,nde->bne", s, params["u"])
    bil = jnp.einsum("bne,bne->bn", tmp, t)
    energy = bil + out_d + out_e + params["bias"]
    return jax.nn.softmax(energy, axis=1)


def init_params(key, enc_dim, dec_dim, hidden, num_labels):
    ks = jax.random.split(key, 8)

    def xavier(k, shape, fan_in, fan_out):
        std = (2.0 / (fan_in + fan_out)) ** 0.5
        return std * jax.random.normal(k, shape, dtype=jnp.float32)

    def linear_w(k, in_dim, out_dim):
        bound = 1.0 / (in_dim ** 0.5)
        return jax.random.uniform(k, (in_dim, out_dim), jnp.float32, -bound, bound)

    def linear_b(k, in_dim, out_dim):
        bound = 1.0 / (in_dim ** 0.5)
        return jax.random.uniform(k, (1, out_dim), jnp.float32, -bound, bound)

    return {
        "w_enc": linear_w(ks[0], enc_dim, hidden),
        "b_enc": linear_b(ks[1], enc_dim, hidden),
        "w_dec": linear_w(ks[2], dec_dim, hidden),
        "b_dec": linear_b(ks[3], dec_dim, hidden),
        "w_d": xavier(ks[4], (num_labels, hidden), hidden, num_labels),
        "w_e": xavier(ks[5], (num_labels, hidden), hidden, num_labels),
        "bias": jnp.zeros((1, num_labels), jnp.float32),
        "u": xavier(ks[6], (num_labels, hidden, hidden),
                    hidden * hidden, num_labels * hidden),
    }


if __name__ == "__main__":
    B = 8            # batch
    N = 4            # num_teachers == num_labels (required by the reference einsums)
    ENC = 32         # input_size_encoder
    DEC = 32         # input_size_decoder
    H = 32           # hidden_size  (N*H = 128 -> lane-dense intermediates; prefer
                     # multiples of 256 for H / N*H on v6e/v7x in production configs)

    key = jax.random.PRNGKey(0)
    k_params, k_s, k_t = jax.random.split(key, 3)
    params = init_params(k_params, ENC, DEC, H, N)

    input_s = jax.random.normal(k_s, (B, ENC), dtype=jnp.float32)
    input_t = jax.random.normal(k_t, (B, N, DEC), dtype=jnp.float32)

    ref = reference(input_s, input_t, params)

    # f32 MXU-operand path (tight numerical check).
    prepped_f32 = prepare_params(params, mxu_dtype=jnp.float32)
    out = jax.block_until_ready(biaffine_attention(input_s, input_t, prepped_f32))
    assert out.shape == (B, N)
    assert jnp.allclose(out, ref, atol=1e-4, rtol=1e-4), "f32 path mismatch vs JAX reference"

    # bf16 MXU-operand path (recommended on v6e/v7x): f32 accumulation + f32 softmax,
    # looser tolerance due to bf16 operand rounding.
    prepped_bf16 = prepare_params(params, mxu_dtype=jnp.bfloat16)
    out_bf16 = jax.block_until_ready(biaffine_attention(input_s, input_t, prepped_bf16))
    assert out_bf16.shape == (B, N)
    assert jnp.allclose(out_bf16, ref, atol=3e-2, rtol=3e-2), "bf16 path mismatch vs JAX reference"

    print("KERNEL_OK")
</pallas_src>

<mosaic_0001>
module attributes {stable_mosaic.version = 11 : i64} {
  func.func @biaffine_kernel(%arg0: i32, %arg1: memref<8x32xf32, #tpu.memory_space<vmem>>, %arg2: memref<8x128xf32, #tpu.memory_space<vmem>>, %arg3: memref<32x32xf32, #tpu.memory_space<vmem>>, %arg4: memref<1x32xf32, #tpu.memory_space<vmem>>, %arg5: memref<32x32xf32, #tpu.memory_space<vmem>>, %arg6: memref<1x32xf32, #tpu.memory_space<vmem>>, %arg7: memref<1x128xf32, #tpu.memory_space<vmem>>, %arg8: memref<32x4xf32, #tpu.memory_space<vmem>>, %arg9: memref<1x4xf32, #tpu.memory_space<vmem>>, %arg10: memref<32x128xf32, #tpu.memory_space<vmem>>, %arg11: memref<128x4xf32, #tpu.memory_space<vmem>>, %arg12: memref<8x4xf32, #tpu.memory_space<vmem>>, %arg13: memref<8x128xf32, #tpu.memory_space<vmem>>) attributes {dimension_semantics = [#tpu.dimension_semantics<parallel>], iteration_bounds = array<i64: 1>, scalar_prefetch = 0 : i64, scratch_operands = 1 : i64, tpu.core_type = #tpu.core_type<tc>, window_params = [{transform_indices = @transform_0, window_bounds = array<i64: 8, 32>}, {transform_indices = @transform_1, window_bounds = array<i64: 8, 128>}, {pipeline_mode = #tpu.pipeline_mode<synchronous>, transform_indices = @transform_2, window_bounds = array<i64: 32, 32>}, {pipeline_mode = #tpu.pipeline_mode<synchronous>, transform_indices = @transform_3, window_bounds = array<i64: 1, 32>}, {pipeline_mode = #tpu.pipeline_mode<synchronous>, transform_indices = @transform_4, window_bounds = array<i64: 32, 32>}, {pipeline_mode = #tpu.pipeline_mode<synchronous>, transform_indices = @transform_5, window_bounds = array<i64: 1, 32>}, {pipeline_mode = #tpu.pipeline_mode<synchronous>, transform_indices = @transform_6, window_bounds = array<i64: 1, 128>}, {pipeline_mode = #tpu.pipeline_mode<synchronous>, transform_indices = @transform_7, window_bounds = array<i64: 32, 4>}, {pipeline_mode = #tpu.pipeline_mode<synchronous>, transform_indices = @transform_8, window_bounds = array<i64: 1, 4>}, {pipeline_mode = #tpu.pipeline_mode<synchronous>, transform_indices = @transform_9, window_bounds = array<i64: 32, 128>}, {pipeline_mode = #tpu.pipeline_mode<synchronous>, transform_indices = @transform_10, window_bounds = array<i64: 128, 4>}, {transform_indices = @transform_11, window_bounds = array<i64: 8, 4>}]} {
    %c0 = arith.constant 0 : index
    %c0_0 = arith.constant 0 : index
    %0 = vector.load %arg1[%c0, %c0_0] : memref<8x32xf32, #tpu.memory_space<vmem>>, vector<8x32xf32>
    %c0_1 = arith.constant 0 : index
    %c0_2 = arith.constant 0 : index
    %1 = vector.load %arg3[%c0_1, %c0_2] : memref<32x32xf32, #tpu.memory_space<vmem>>, vector<32x32xf32>
    %cst = arith.constant dense<0.000000e+00> : vector<8x32xf32>
    %2 = tpu.matmul %0, %1, %cst {dimension_numbers = #tpu.dot_dimension_numbers<[1], [0], [0], [1], [0, 0, 1, 1], [], []>} : vector<8x32xf32>, vector<32x32xf32>, vector<8x32xf32> -> vector<8x32xf32>
    %c0_3 = arith.constant 0 : index
    %c0_4 = arith.constant 0 : index
    %3 = vector.load %arg4[%c0_3, %c0_4] : memref<1x32xf32, #tpu.memory_space<vmem>>, vector<1x32xf32>
    %4 = vector.broadcast %3 : vector<1x32xf32> to vector<8x32xf32>
    %5 = arith.addf %2, %4 : vector<8x32xf32>
    %c0_5 = arith.constant 0 : index
    %c0_6 = arith.constant 0 : index
    %6 = vector.load %arg2[%c0_5, %c0_6] : memref<8x128xf32, #tpu.memory_space<vmem>>, vector<8x32xf32>
    %c0_7 = arith.constant 0 : index
    %c0_8 = arith.constant 0 : index
    %7 = vector.load %arg5[%c0_7, %c0_8] : memref<32x32xf32, #tpu.memory_space<vmem>>, vector<32x32xf32>
    %cst_9 = arith.constant dense<0.000000e+00> : vector<8x32xf32>
    %8 = tpu.matmul %6, %7, %cst_9 {dimension_numbers = #tpu.dot_dimension_numbers<[1], [0], [0], [1], [0, 0, 1, 1], [], []>} : vector<8x32xf32>, vector<32x32xf32>, vector<8x32xf32> -> vector<8x32xf32>
    %c0_10 = arith.constant 0 : index
    %c0_11 = arith.constant 0 : index
    %9 = vector.load %arg6[%c0_10, %c0_11] : memref<1x32xf32, #tpu.memory_space<vmem>>, vector<1x32xf32>
    %10 = vector.broadcast %9 : vector<1x32xf32> to vector<8x32xf32>
    %11 = arith.addf %8, %10 : vector<8x32xf32>
    %c0_12 = arith.constant 0 : index
    %c0_13 = arith.constant 0 : index
    %12 = vector.load %arg13[%c0_12, %c0_13] : memref<8x128xf32, #tpu.memory_space<vmem>>, vector<8x32xf32>
    tpu.vector_store %arg13[%c0_12, %c0_13], %11 {strides = array<i32>} : memref<8x128xf32, #tpu.memory_space<vmem>>, vector<8x32xf32>,
    %c0_14 = arith.constant 0 : index
    %c32 = arith.constant 32 : index
    %13 = vector.load %arg2[%c0_14, %c32] : memref<8x128xf32, #tpu.memory_space<vmem>>, vector<8x32xf32>
    %c0_15 = arith.constant 0 : index
    %c0_16 = arith.constant 0 : index
    %14 = vector.load %arg5[%c0_15, %c0_16] : memref<32x32xf32, #tpu.memory_space<vmem>>, vector<32x32xf32>
    %cst_17 = arith.constant dense<0.000000e+00> : vector<8x32xf32>
    %15 = tpu.matmul %13, %14, %cst_17 {dimension_numbers = #tpu.dot_dimension_numbers<[1], [0], [0], [1], [0, 0, 1, 1], [], []>} : vector<8x32xf32>, vector<32x32xf32>, vector<8x32xf32> -> vector<8x32xf32>
    %c0_18 = arith.constant 0 : index
    %c0_19 = arith.constant 0 : index
    %16 = vector.load %arg6[%c0_18, %c0_19] : memref<1x32xf32, #tpu.memory_space<vmem>>, vector<1x32xf32>
    %17 = vector.broadcast %16 : vector<1x32xf32> to vector<8x32xf32>
    %18 = arith.addf %15, %17 : vector<8x32xf32>
    %c0_20 = arith.constant 0 : index
    %c32_21 = arith.constant 32 : index
    %19 = vector.load %arg13[%c0_20, %c32_21] : memref<8x128xf32, #tpu.memory_space<vmem>>, vector<8x32xf32>
    tpu.vector_store %arg13[%c0_20, %c32_21], %18 {strides = array<i32>} : memref<8x128xf32, #tpu.memory_space<vmem>>, vector<8x32xf32>,
    %c0_22 = arith.constant 0 : index
    %c64 = arith.constant 64 : index
    %20 = vector.load %arg2[%c0_22, %c64] : memref<8x128xf32, #tpu.memory_space<vmem>>, vector<8x32xf32>
    %c0_23 = arith.constant 0 : index
    %c0_24 = arith.constant 0 : index
    %21 = vector.load %arg5[%c0_23, %c0_24] : memref<32x32xf32, #tpu.memory_space<vmem>>, vector<32x32xf32>
    %cst_25 = arith.constant dense<0.000000e+00> : vector<8x32xf32>
    %22 = tpu.matmul %20, %21, %cst_25 {dimension_numbers = #tpu.dot_dimension_numbers<[1], [0], [0], [1], [0, 0, 1, 1], [], []>} : vector<8x32xf32>, vector<32x32xf32>, vector<8x32xf32> -> vector<8x32xf32>
    %c0_26 = arith.constant 0 : index
    %c0_27 = arith.constant 0 : index
    %23 = vector.load %arg6[%c0_26, %c0_27] : memref<1x32xf32, #tpu.memory_space<vmem>>, vector<1x32xf32>
    %24 = vector.broadcast %23 : vector<1x32xf32> to vector<8x32xf32>
    %25 = arith.addf %22, %24 : vector<8x32xf32>
    %c0_28 = arith.constant 0 : index
    %c64_29 = arith.constant 64 : index
    %26 = vector.load %arg13[%c0_28, %c64_29] : memref<8x128xf32, #tpu.memory_space<vmem>>, vector<8x32xf32>
    tpu.vector_store %arg13[%c0_28, %c64_29], %25 {strides = array<i32>} : memref<8x128xf32, #tpu.memory_space<vmem>>, vector<8x32xf32>,
    %c0_30 = arith.constant 0 : index
    %c96 = arith.constant 96 : index
    %27 = vector.load %arg2[%c0_30, %c96] : memref<8x128xf32, #tpu.memory_space<vmem>>, vector<8x32xf32>
    %c0_31 = arith.constant 0 : index
    %c0_32 = arith.constant 0 : index
    %28 = vector.load %arg5[%c0_31, %c0_32] : memref<32x32xf32, #tpu.memory_space<vmem>>, vector<32x32xf32>
    %cst_33 = arith.constant dense<0.000000e+00> : vector<8x32xf32>
    %29 = tpu.matmul %27, %28, %cst_33 {dimension_numbers = #tpu.dot_dimension_numbers<[1], [0], [0], [1], [0, 0, 1, 1], [], []>} : vector<8x32xf32>, vector<32x32xf32>, vector<8x32xf32> -> vector<8x32xf32>
    %c0_34 = arith.constant 0 : index
    %c0_35 = arith.constant 0 : index
    %30 = vector.load %arg6[%c0_34, %c0_35] : memref<1x32xf32, #tpu.memory_space<vmem>>, vector<1x32xf32>
    %31 = vector.broadcast %30 : vector<1x32xf32> to vector<8x32xf32>
    %32 = arith.addf %29, %31 : vector<8x32xf32>
    %c0_36 = arith.constant 0 : index
    %c96_37 = arith.constant 96 : index
    %33 = vector.load %arg13[%c0_36, %c96_37] : memref<8x128xf32, #tpu.memory_space<vmem>>, vector<8x32xf32>
    tpu.vector_store %arg13[%c0_36, %c96_37], %32 {strides = array<i32>} : memref<8x128xf32, #tpu.memory_space<vmem>>, vector<8x32xf32>,
    %c0_38 = arith.constant 0 : index
    %c0_39 = arith.constant 0 : index
    %34 = vector.load %arg13[%c0_38, %c0_39] : memref<8x128xf32, #tpu.memory_space<vmem>>, vector<8x128xf32>
    %c0_40 = arith.constant 0 : index
    %c0_41 = arith.constant 0 : index
    %35 = vector.load %arg10[%c0_40, %c0_41] : memref<32x128xf32, #tpu.memory_space<vmem>>, vector<32x128xf32>
    %cst_42 = arith.constant dense<0.000000e+00> : vector<8x128xf32>
    %36 = tpu.matmul %5, %35, %cst_42 {dimension_numbers = #tpu.dot_dimension_numbers<[1], [0], [0], [1], [0, 0, 1, 1], [], []>} : vector<8x32xf32>, vector<32x128xf32>, vector<8x128xf32> -> vector<8x128xf32>
    %c0_43 = arith.constant 0 : index
    %c0_44 = arith.constant 0 : index
    %37 = vector.load %arg7[%c0_43, %c0_44] : memref<1x128xf32, #tpu.memory_space<vmem>>, vector<1x128xf32>
    %38 = vector.broadcast %37 : vector<1x128xf32> to vector<8x128xf32>
    %39 = arith.addf %36, %38 : vector<8x128xf32>
    %40 = arith.mulf %39, %34 : vector<8x128xf32>
    %c0_45 = arith.constant 0 : index
    %c0_46 = arith.constant 0 : index
    %41 = vector.load %arg11[%c0_45, %c0_46] : memref<128x4xf32, #tpu.memory_space<vmem>>, vector<128x4xf32>
    %cst_47 = arith.constant dense<0.000000e+00> : vector<8x4xf32>
    %42 = tpu.matmul %40, %41, %cst_47 {dimension_numbers = #tpu.dot_dimension_numbers<[1], [0], [0], [1], [0, 0, 1, 1], [], []>} : vector<8x128xf32>, vector<128x4xf32>, vector<8x4xf32> -> vector<8x4xf32>
    %c0_48 = arith.constant 0 : index
    %c0_49 = arith.constant 0 : index
    %43 = vector.load %arg8[%c0_48, %c0_49] : memref<32x4xf32, #tpu.memory_space<vmem>>, vector<32x4xf32>
    %cst_50 = arith.constant dense<0.000000e+00> : vector<8x4xf32>
    %44 = tpu.matmul %5, %43, %cst_50 {dimension_numbers = #tpu.dot_dimension_numbers<[1], [0], [0], [1], [0, 0, 1, 1], [], []>} : vector<8x32xf32>, vector<32x4xf32>, vector<8x4xf32> -> vector<8x4xf32>
    %45 = arith.addf %42, %44 : vector<8x4xf32>
    %c0_51 = arith.constant 0 : index
    %c0_52 = arith.constant 0 : index
    %46 = vector.load %arg9[%c0_51, %c0_52] : memref<1x4xf32, #tpu.memory_space<vmem>>, vector<1x4xf32>
    %47 = vector.broadcast %46 : vector<1x4xf32> to vector<8x4xf32>
    %48 = arith.addf %45, %47 : vector<8x4xf32>
    %cst_53 = arith.constant dense<0xFF800000> : vector<8xf32>
    %49 = vector.multi_reduction <maximumf>, %48, %cst_53 [1] : vector<8x4xf32> to vector<8xf32>
    %50 = vector.shape_cast %49 : vector<8xf32> to vector<8x1xf32>
    %51 = vector.broadcast %50 : vector<8x1xf32> to vector<8x4xf32>
    %52 = arith.subf %48, %51 : vector<8x4xf32>
    %53 = math.exp %52 : vector<8x4xf32>
    %cst_54 = arith.constant dense<0.000000e+00> : vector<8xf32>
    %54 = vector.multi_reduction <add>, %53, %cst_54 [1] : vector<8x4xf32> to vector<8xf32>
    %55 = vector.shape_cast %54 : vector<8xf32> to vector<8x1xf32>
    %56 = tpu.reciprocal %55 {approx = true} : vector<8x1xf32> -> vector<8x1xf32>
    %57 = arith.mulf %55, %56 : vector<8x1xf32>
    %cst_55 = arith.constant 2.000000e+00 : f32
    %58 = vector.broadcast %cst_55 : f32 to vector<8x1xf32>
    %59 = arith.subf %58, %57 : vector<8x1xf32>
    %60 = arith.mulf %56, %59 : vector<8x1xf32>
    %61 = vector.broadcast %60 : vector<8x1xf32> to vector<8x4xf32>
    %62 = arith.mulf %53, %61 : vector<8x4xf32>
    %c0_56 = arith.constant 0 : index
    %c0_57 = arith.constant 0 : index
    %63 = vector.load %arg12[%c0_56, %c0_57] : memref<8x4xf32, #tpu.memory_space<vmem>>, vector<8x4xf32>
    tpu.vector_store %arg12[%c0_56, %c0_57], %62 {strides = array<i32>} : memref<8x4xf32, #tpu.memory_space<vmem>>, vector<8x4xf32>,
    return
  }
  func.func @transform_0(%arg0: i32) -> (i32, i32) {
    %c0_i32 = arith.constant 0 : i32
    %c0_i32_0 = arith.constant 0 : i32
    return %arg0, %c0_i32 : i32, i32
  }
  func.func @transform_1(%arg0: i32) -> (i32, i32) {
    %c0_i32 = arith.constant 0 : i32
    %c0_i32_0 = arith.constant 0 : i32
    return %arg0, %c0_i32 : i32, i32
  }
  func.func @transform_2(%arg0: i32) -> (i32, i32) {
    %c0_i32 = arith.constant 0 : i32
    %c0_i32_0 = arith.constant 0 : i32
    %c0_i32_1 = arith.constant 0 : i32
    return %c0_i32, %c0_i32_0 : i32, i32
  }
  func.func @transform_3(%arg0: i32) -> (i32, i32) {
    %c0_i32 = arith.constant 0 : i32
    %c0_i32_0 = arith.constant 0 : i32
    %c0_i32_1 = arith.constant 0 : i32
    return %c0_i32, %c0_i32_0 : i32, i32
  }
  func.func @transform_4(%arg0: i32) -> (i32, i32) {
    %c0_i32 = arith.constant 0 : i32
    %c0_i32_0 = arith.constant 0 : i32
    %c0_i32_1 = arith.constant 0 : i32
    return %c0_i32, %c0_i32_0 : i32, i32
  }
  func.func @transform_5(%arg0: i32) -> (i32, i32) {
    %c0_i32 = arith.constant 0 : i32
    %c0_i32_0 = arith.constant 0 : i32
    %c0_i32_1 = arith.constant 0 : i32
    return %c0_i32, %c0_i32_0 : i32, i32
  }
  func.func @transform_6(%arg0: i32) -> (i32, i32) {
    %c0_i32 = arith.constant 0 : i32
    %c0_i32_0 = arith.constant 0 : i32
    %c0_i32_1 = arith.constant 0 : i32
    return %c0_i32, %c0_i32_0 : i32, i32
  }
  func.func @transform_7(%arg0: i32) -> (i32, i32) {
    %c0_i32 = arith.constant 0 : i32
    %c0_i32_0 = arith.constant 0 : i32
    %c0_i32_1 = arith.constant 0 : i32
    return %c0_i32, %c0_i32_0 : i32, i32
  }
  func.func @transform_8(%arg0: i32) -> (i32, i32) {
    %c0_i32 = arith.constant 0 : i32
    %c0_i32_0 = arith.constant 0 : i32
    %c0_i32_1 = arith.constant 0 : i32
    return %c0_i32, %c0_i32_0 : i32, i32
  }
  func.func @transform_9(%arg0: i32) -> (i32, i32) {
    %c0_i32 = arith.constant 0 : i32
    %c0_i32_0 = arith.constant 0 : i32
    %c0_i32_1 = arith.constant 0 : i32
    return %c0_i32, %c0_i32_0 : i32, i32
  }
  func.func @transform_10(%arg0: i32) -> (i32, i32) {
    %c0_i32 = arith.constant 0 : i32
    %c0_i32_0 = arith.constant 0 : i32
    %c0_i32_1 = arith.constant 0 : i32
    return %c0_i32, %c0_i32_0 : i32, i32
  }
  func.func @transform_11(%arg0: i32) -> (i32, i32) {
    %c0_i32 = arith.constant 0 : i32
    %c0_i32_0 = arith.constant 0 : i32
    return %arg0, %c0_i32 : i32, i32
  }
}

</mosaic_0001>

<bundles_post_ra>
// kernel: tpu_custom_call.1
= control target key start
LH: loop header
LB: loop body
LE: loop exit
PB: predicated region body
PF: predicated region fallthrough
CT: control target
= control target key end

     0   :  { %v1017_v1 = vmov 0.0|0.0   ;;  %vm1018_vm0 = vmmov 0   ;;  %v1019_v4 = vmov 0.0   ;;  %s1020_s23 = smov 96   ;;  %s1022_s16 = smov 64   ;;  %vm50_vm1 = vcmask 261120   ;;  %s1255_s1 = inlined_call_operand.vmem [shape: f32[8,128], index: 1, kind: input, shape index: {}]   ;;  %s1256_s2 = inlined_call_operand.vmem [shape: f32[32,32], index: 2, kind: input, shape index: {}]   ;;  %s1257_s4 = inlined_call_operand.vmem [shape: f32[32,32], index: 4, kind: input, shape index: {}]   ;;  %s1258_s0 = inlined_call_operand.vmem [shape: f32[8,32], index: 0, kind: input, shape index: {}]   ;;  %s1259_s9 = inlined_call_operand.vmem [shape: f32[32,128], index: 9, kind: input, shape index: {}]   ;;  %s1260_s7 = inlined_call_operand.vmem [shape: f32[32,4], index: 7, kind: input, shape index: {}]   ;;  %s1261_s10 = inlined_call_operand.vmem [shape: f32[128,4], index: 10, kind: input, shape index: {}]   ;;  %s1262_s3 = inlined_call_operand.vmem [shape: f32[1,32], index: 3, kind: input, shape index: {}]   ;;  %s1263_s5 = inlined_call_operand.vmem [shape: f32[1,32], index: 5, kind: input, shape index: {}]   ;;  %s1264_s6 = inlined_call_operand.vmem [shape: f32[1,128], index: 6, kind: input, shape index: {}]   ;;  %s1265_s8 = inlined_call_operand.vmem [shape: f32[1,4], index: 8, kind: input, shape index: {}]   ;;  %s1266_s11 = inlined_call_operand.vmem [shape: f32[8,4], index: 11, kind: output, shape index: {}]  }
   0x1   :  { %v210_v0 = vld [vmem:[%s1255_s1] sm:$0xff]  ;;  %941 = vmatprep.subr.bf16.mxu0 %v1017_v1  ;;  %v40_v3 = vld [vmem:[%s1256_s2 + $0x8] sm:$0xff]  ;;  %837 = vmatprep.mubr.msk.f32.mxu0 %vm1018_vm0, %v1019_v4  ;;  %s1021_s1 = smov 32   ;;  %v41_v6 = vld [vmem:[%s1256_s2 + $0x10] sm:$0xff]  ;;  %vm301_vm2 = vcmask 523520   ;;  %vm394_vm3 = vcmask 785920  }
   0x2   :  { %v39_v2 = vld [vmem:[%s1256_s2] sm:$0xff]  ;;  %223 = vrot.lane.b32.xlu0 %v210_v0, %s1020_s23  ;;  %409 = vrot.lane.b32.xlu1 %v210_v0, %s1021_s1  ;;  %v42_v7 = vld [vmem:[%s1256_s2 + $0x18] sm:$0xff]  ;;  %vm487_vm4 = vcmask 1048320   ;;  %vm743_vm5 = vcmask 31744  }
   0x3   :  { %v942_v5 = vpack.c.bf16 %v40_v3, %v39_v2  ;;  %v125_v8 = vld [vmem:[%s1257_s4] sm:$0xff]  ;;  %v126_v9 = vld [vmem:[%s1257_s4 + $0x8] sm:$0xff]  ;;  %959 = vmatprep.subr.bf16.mxu1 %v1017_v1  ;;  %870 = vmatprep.mubr.msk.f32.mxu1 %vm1018_vm0, %v1019_v4  ;;  %v945_v10 = vpack.c.bf16 %v42_v7, %v41_v6  ;;  %v127_v12 = vld [vmem:[%s1257_s4 + $0x10] sm:$0xff] }
   0x4   :  { %v948_v11 = vpack.c.bf16 %v126_v9, %v125_v8  ;;  %v128_v13 = vld [vmem:[%s1257_s4 + $0x18] sm:$0xff]  ;;  %v38_v14 = vld [vmem:[%s1258_s0] sm:$0xff]  ;;  %v491_v17 = vld [vmem:[%s1259_s9 + $0x8] sm:$0xff] }
   0x5   :  { %943 = vmatpush3.bf16.msra.mxu0 %v942_v5  ;;  %v951_v15 = vpack.c.bf16 %v128_v13, %v127_v12  ;;  %v490_v16 = vld [vmem:[%s1259_s9] sm:$0xff]  ;;  %v592_v21 = vld [vmem:[%s1260_s7 + $0x8] sm:$0xff]  ;;  %v492_v22 = vld [vmem:[%s1259_s9 + $0x10] sm:$0xff] }
   0x6   :  { %944 = vmatprep.subr.bf16.mxu0 %v1017_v1  ;;  %316 = vrot.lane.b32.xlu0 %v210_v0, %s1022_s16  ;;  %v972_v19 = vpack.c.bf16 %v491_v17, %v490_v16  ;;  %v591_v20 = vld [vmem:[%s1260_s7] sm:$0xff]  ;;  %v493_v23 = vld [vmem:[%s1259_s9 + $0x18] sm:$0xff]  ;;  %v593_v28 = vld [vmem:[%s1260_s7 + $0x10] sm:$0xff] }
   0x7   :  { %961 = vmatpush3.bf16.msra.mxu1 %v948_v11  ;;  %v978_v26 = vpack.c.bf16 %v592_v21, %v591_v20  ;;  %v975_v27 = vpack.c.bf16 %v493_v23, %v492_v22  ;;  %v594_v29 = vld [vmem:[%s1260_s7 + $0x18] sm:$0xff]  ;;  %v575_v31 = vld [vmem:[%s1261_s10] sm:$0xff]  ;;  %v576_v32 = vld [vmem:[%s1261_s10 + $0x8] sm:$0xff] }
   0x8   :  { %962 = vmatprep.subr.bf16.mxu1 %v1017_v1  ;;  %v981_v30 = vpack.c.bf16 %v594_v29, %v593_v28  ;;  %v763_v33 = vld [vmem:[%s1262_s3] ss:$0 sm:$0xff]  ;;  %v984_v35 = vpack.c.bf16 %v576_v32, %v575_v31  ;;  %v577_v38 = vld [vmem:[%s1261_s10 + $0x10] sm:$0xff]  ;;  %v578_v39 = vld [vmem:[%s1261_s10 + $0x18] sm:$0xff] }
   0x9   :  { %946 = vmatpush3.bf16.msra.mxu0 %v945_v10  ;;  %v987_v40 = vpack.c.bf16 %v578_v39, %v577_v38  ;;  %v579_v41 = vld [vmem:[%s1261_s10 + $0x20] sm:$0xff]  ;;  %v580_v42 = vld [vmem:[%s1261_s10 + $0x28] sm:$0xff]  ;;  %v581_v48 = vld [vmem:[%s1261_s10 + $0x30] sm:$0xff] }
   0xa   :  { %947 = vmatprep.subr.bf16.mxu0 %v1017_v1  ;;  %v765_v43 = vld [vmem:[%s1263_s5] ss:$0 sm:$0xff]  ;;  %v990_v45 = vpack.c.bf16 %v580_v42, %v579_v41  ;;  %v582_v49 = vld [vmem:[%s1261_s10 + $0x38] sm:$0xff]  ;;  %v584_v52 = vld [vmem:[%s1261_s10 + $0x48] sm:$0xff] }
   0xb   :  { %964 = vmatpush3.bf16.msra.mxu1 %v951_v15  ;;  %v993_v50 = vpack.c.bf16 %v582_v49, %v581_v48  ;;  %v583_v51 = vld [vmem:[%s1261_s10 + $0x40] sm:$0xff]  ;;  %v585_v54 = vld [vmem:[%s1261_s10 + $0x50] sm:$0xff]  ;;  %v586_v55 = vld [vmem:[%s1261_s10 + $0x58] sm:$0xff] }
   0xc   :  { %838 = vmatmul.mubr.msk.f32.vlgmr.msra.gmra.mrb[0].mxu0 %vm50_vm1, %v38_v14  ;;  %971 = vmatprep.subr.bf16.mxu1 %v1017_v1  ;;  %v996_v53 = vpack.c.bf16 %v584_v52, %v583_v51  ;;  %v999_v56 = vpack.c.bf16 %v586_v55, %v585_v54  ;;  %v587_v57 = vld [vmem:[%s1261_s10 + $0x60] sm:$0xff]  ;;  %v588_v58 = vld [vmem:[%s1261_s10 + $0x68] sm:$0xff]  ;;  %v589_v63 = vld [vmem:[%s1261_s10 + $0x70] sm:$0xff] }
   0xd   :  { %949 = vmatpush3.bf16.msra.mxu0 %v948_v11  ;;  %848 = vmatprep.mubr.msk.f32.mxu0 %vm1018_vm0, %v1019_v4  ;;  %v1002_v59 = vpack.c.bf16 %v588_v58, %v587_v57  ;;  %v776_v20 = vld [vmem:[%s1265_s8] ss:$0 sm:$0xff] }
   0xe   :  { %950 = vmatprep.subr.bf16.mxu0 %v1017_v1 }
  0x11   :  { %952 = vmatpush3.bf16.msra.mxu0 %v951_v15 }
  0x12   :  { %953 = vmatprep.subr.bf16.mxu0 %v1017_v1 }
  0x14   :  { %849 = vmatmul.mubr.msk.f32.vlgmr.msra.gmra.mrb[2].mxu0 %vm50_vm1, %v210_v0  ;;  %v590_v0 = vld [vmem:[%s1261_s10 + $0x78] sm:$0xff] }
  0x15   :  { %955 = vmatpush3.bf16.msra.mxu0 %v948_v11  ;;  %859 = vmatprep.mubr.msk.f32.mxu0 %vm1018_vm0, %v1019_v4  ;;  %v1005_v2 = vpack.c.bf16 %v590_v0, %v589_v63 }
  0x16   :  { %956 = vmatprep.subr.bf16.mxu0 %v1017_v1 }
  0x19   :  { %958 = vmatpush3.bf16.msra.mxu0 %v951_v15 }
  0x1a   :  { %965 = vmatprep.subr.bf16.mxu0 %v1017_v1 }
  0x74   :  { %v224_v18 = vpop.permute.xlu0 %223  ;;  %v410_v25 = vpop.permute.xlu1 %409 }
  0x75   :  { %860 = vmatmul.mubr.msk.f32.vlgmr.msra.gmra.mrb[4].mxu0 %vm50_vm1, %v224_v18 }
  0x76   :  { %967 = vmatpush3.bf16.msra.mxu0 %v948_v11  ;;  %881 = vmatprep.mubr.msk.f32.mxu0 %vm1018_vm0, %v1019_v4 }
  0x77   :  { %968 = vmatprep.subr.bf16.mxu0 %v1017_v1 }
  0x78   :  { %v317_v24 = vpop.permute.xlu0 %316 }
  0x79   :  { %871 = vmatmul.mubr.msk.f32.vlgmr.msra.gmra.mrb[0].mxu1 %vm50_vm1, %v317_v24 }
  0x7a   :  { %970 = vmatpush3.bf16.msra.mxu0 %v951_v15  ;;  %973 = vmatpush3.bf16.msra.mxu1 %v972_v19  ;;  %v773_v15 = vld [vmem:[%s1264_s6] ss:$0 sm:$0xff] }
  0x7b   :  { %977 = vmatprep.subr.bf16.mxu0 %v1017_v1  ;;  %974 = vmatprep.subr.bf16.mxu1 %v1017_v1 }
  0x7c   :  { %892 = vmatprep.mubr.msk.f32.mxu1 %vm1018_vm0, %v1019_v4 }
  0x7d   :  { %882 = vmatmul.mubr.msk.f32.vlgmr.msra.gmra.mrb[6].mxu0 %vm50_vm1, %v410_v25 }
  0x7e   :  { %979 = vmatpush3.bf16.msra.mxu0 %v978_v26  ;;  %976 = vmatpush3.bf16.msra.mxu1 %v975_v27 }
  0x7f   :  { %980 = vmatprep.subr.bf16.mxu0 %v1017_v1  ;;  %903 = vmatprep.mubr.msk.f32.mxu0 %vm1018_vm0, %v1019_v4 }
  0x80   :  { %983 = vmatprep.subr.bf16.mxu1 %v1017_v1 }
  0x82   :  { %982 = vmatpush3.bf16.msra.mxu0 %v981_v30 }
  0xdf   :  { %v120_v34 = vpop.f32.mrb[0].mxu0 }
  0xe0   :  { %v121_v36 = vadd.f32 %v763_v33, %v120_v34  ;;  %v839_v37 = vpop.f32.mrb[1].mxu0 }
  0xe2   :  { %893 = vmatmul.mubr.msk.f32.vlgmr.msra.gmra.mrb[2].mxu1 %vm50_vm1, %v121_v36  ;;  %904 = vmatmul.mubr.msk.f32.vlgmr.msra.gmra.mrb[8].mxu0 %vm50_vm1, %v121_v36 }
  0xe3   :  { %985 = vmatpush3.bf16.msra.mxu1 %v984_v35  ;;  %938 = vmatprep.mubr.msk.f32.mxu1 %vm1018_vm0, %v1019_v4 }
  0xe4   :  { %986 = vmatprep.subr.bf16.mxu1 %v1017_v1 }
  0xe7   :  { %v205_v44 = vpop.f32.mrb[2].mxu0  ;;  %988 = vmatpush3.bf16.msra.mxu1 %v987_v40 }
  0xe8   :  { %v206_v46 = vadd.f32 %v765_v43, %v205_v44  ;;  %v850_v47 = vpop.f32.mrb[3].mxu0  ;;  %989 = vmatprep.subr.bf16.mxu1 %v1017_v1 }
  0xea   :  { %209 = vst.msk [vmem:[#allocation2] sm:$0xff] %vm50_vm1, %v206_v46 }
  0xeb   :  { %991 = vmatpush3.bf16.msra.mxu1 %v990_v45 }
  0xec   :  { %992 = vmatprep.subr.bf16.mxu1 %v1017_v1 }
  0xef   :  { %994 = vmatpush3.bf16.msra.mxu1 %v993_v50 }
  0xf0   :  { %995 = vmatprep.subr.bf16.mxu1 %v1017_v1 }
  0xf3   :  { %997 = vmatpush3.bf16.msra.mxu1 %v996_v53 }
  0xf4   :  { %998 = vmatprep.subr.bf16.mxu1 %v1017_v1 }
  0xf7   :  { %1000 = vmatpush3.bf16.msra.mxu1 %v999_v56 }
  0xf8   :  { %1001 = vmatprep.subr.bf16.mxu1 %v1017_v1 }
  0xfb   :  { %1003 = vmatpush3.bf16.msra.mxu1 %v1002_v59 }
  0xfc   :  { %1004 = vmatprep.subr.bf16.mxu1 %v1017_v1 }
  0xff   :  { %1006 = vmatpush3.bf16.msra.mxu1 %v1005_v2 }
 0x148   :  { %v293_v60 = vpop.f32.mrb[4].mxu0 }
 0x149   :  { %v294_v61 = vadd.f32 %v765_v43, %v293_v60  ;;  %v861_v62 = vpop.f32.mrb[5].mxu0 }
 0x14b   :  { %298 = vrot.lane.b32.xlu1 %v294_v61, %s1021_s1 }
 0x14c   :  { %v386_v3 = vpop.f32.mrb[0].mxu1 }
 0x14d   :  { %v387_v4 = vadd.f32 %v765_v43, %v386_v3  ;;  %v872_v5 = vpop.f32.mrb[1].mxu1 }
 0x14f   :  { %391 = vrot.lane.b32.xlu0 %v387_v4, %s1022_s16 }
 0x150   :  { %v479_v6 = vpop.f32.mrb[6].mxu0 }
 0x151   :  { %v480_v7 = vadd.f32 %v765_v43, %v479_v6  ;;  %v883_v1 = vpop.f32.mrb[7].mxu0 }
 0x153   :  { %484 = vrot.lane.b32.xlu1 %v480_v7, %s1020_s23 }
 0x1b5   :  { %v570_v8 = vpop.f32.mrb[2].mxu1  ;;  %v661_v9 = vpop.f32.mrb[8].mxu0 }
 0x1b6   :  { %v894_v10 = vpop.f32.mrb[3].mxu1  ;;  %v905_v11 = vpop.f32.mrb[9].mxu0  ;;  %v571_v16 = vadd.f32 %v773_v15, %v570_v8 }
 0x1bd   :  { %v299_v12 = vpop.permute.xlu1 %298 }
 0x1be   :  { %302 = vst.msk [vmem:[#allocation2] sm:$0xff] %vm301_vm2, %v299_v12 }
 0x1c1   :  { %v392_v13 = vpop.permute.xlu0 %391 }
 0x1c2   :  { %395 = vst.msk [vmem:[#allocation2] sm:$0xff] %vm394_vm3, %v392_v13 }
 0x1c5   :  { %v485_v14 = vpop.permute.xlu1 %484 }
 0x1c6   :  { %488 = vst.msk [vmem:[#allocation2] sm:$0xff] %vm487_vm4, %v485_v14 }
 0x1cd   :  { %v489_v17 = vld [vmem:[#allocation2] sm:$0xff] }
 0x1ce   :  { %v574_v18 = vmul.f32 %v571_v16, %v489_v17 }
 0x1d0   :  { %939 = vmatmul.mubr.f32.vlgmr.msra.gmra.mrb[4].mxu1 %v574_v18 }
 0x2a3   :  { %v731_v19 = vpop.f32.mrb[4].mxu1 }
 0x2a4   :  { %v732_v21 = vadd.f32 %v731_v19, %v661_v9  ;;  %v940_v22 = vpop.f32.mrb[5].mxu1 }
 0x2a6   :  { %v742_v23 = vadd.f32 %v776_v20, %v732_v21 }
 0x2a8   :  { %v744_v24 = vsel %vm743_vm5, %v742_v23, -inf }
 0x2a9   :  { %745 = vmax.xlane.f32.xlu0 %v744_v24 }
 0x336   :  { %v746_v25 = vpop.xlane.xlu0 %745 }
 0x337   :  { %v747_v26 = vsub.f32 %v742_v23, %v746_v25 }
 0x339   :  { %v748_v27 = vmul.f32 1.442695, %v747_v26 }
 0x33b   :  { %1013 = vpow2.f32 %v748_v27 }
 0x345   :  { %v1014_v28 = vpop.eup %1013 }
 0x346   :  { %v750_v29 = vsel %vm743_vm5, %v1014_v28, 0.0 }
 0x347   :  { %751 = vadd.xlane.f32.xlu1 %v750_v29 }
 0x3d4   :  { %v752_v30 = vpop.xlane.xlu1 %751 }
 0x3d5   :  { %1015 = vrcp.f32 %v752_v30 }
 0x3df   :  { %v1016_v31 = vpop.eup %1015 }
 0x3e0   :  { %v754_v32 = vmul.f32 %v1016_v31, %v752_v30 }
 0x3e2   :  { %v755_v33 = vsub.f32 2.0, %v754_v32 }
 0x3e4   :  { %v756_v34 = vmul.f32 %v1016_v31, %v755_v33 }
 0x3e6   :  { %v757_v35 = vmul.f32 %v1014_v28, %v756_v34 }
 0x3e8   :  { %758 = vst.msk [vmem:[%s1266_s11] sm:$0xff] %vm743_vm5, %v757_v35 }

</bundles_post_ra>
